<compile_context>
chip_gen: v7x
topology: tpu7x:2x2x1
jax: 0.10.0
libtpu: 0.0.40
codegen_flags: <defaults>
</compile_context>

<pallas_src>
import functools

import jax
import jax.numpy as jnp
from jax.experimental import pallas as pl
from jax.experimental.pallas import tpu as pltpu


def _round_up(n, m):
    return ((n + m - 1) // m) * m


def _layer_norm(v, g, b, c_real, eps=1e-5):
    # Padded channels of v / g / b are exactly zero, so plain lane-axis sums
    # divided by the real channel count reproduce LayerNorm over real channels.
    s = jnp.sum(v, axis=-1, keepdims=True)
    ss = jnp.sum(v * v, axis=-1, keepdims=True)
    inv_c = 1.0 / c_real
    mu = s * inv_c
    var = ss * inv_c - mu * mu
    return (v - mu) * jax.lax.rsqrt(var + eps) * g + b


def lconv_block_kernel(x_ref, ln1g_ref, ln1b_ref, glu_w_ref, glu_b_ref, lw_ref,
                       ln2g_ref, ln2b_ref, w1_ref, b1_ref, w2_ref, b2_ref,
                       o_ref, *, kernel_size, t_tile, t_real, c_real):
    K = kernel_size
    P = K // 2
    TH = t_tile + K - 1

    xh = x_ref[0, 0].astype(jnp.float32)                 # (TH, Cp) halo'd window
    Cp = xh.shape[-1]

    # Rows of the halo window that fall outside the real sequence [0, t_real):
    # the reference conv1d zero-pads h there, so mask them to zero after GLU.
    t0 = pl.program_id(1) * t_tile
    row = jax.lax.broadcasted_iota(jnp.int32, (TH, 1), 0)
    gpos = row + t0 - P
    valid = jnp.logical_and(gpos >= 0, gpos < t_real).astype(jnp.float32)

    # --- LayerNorm1 + fused GLU (single (Cp, 2Cp) bf16 MXU matmul) --------
    h = _layer_norm(xh, ln1g_ref[...], ln1b_ref[...], c_real)
    glu = jnp.dot(h.astype(jnp.bfloat16), glu_w_ref[...],
                  preferred_element_type=jnp.float32) + glu_b_ref[...]
    gate = glu[:, Cp:]
    sig = pl.reciprocal(1.0 + jnp.exp(-gate), approx=True)   # sigmoid on EUP
    h = glu[:, :Cp] * sig
    h = h * valid                                        # zeros outside the seq

    # --- Lightweight conv: K static slices of the halo'd GLU output -------
    w_sm = lw_ref[...]                                   # (K, Cp) softmax taps
    acc = w_sm[0:1, :] * h[0:t_tile, :]
    for k in range(1, K):                                # static unroll, K small
        acc = acc + w_sm[k:k + 1, :] * h[k:k + t_tile, :]

    x1 = acc + xh[P:P + t_tile, :]                       # residual 1

    # --- LayerNorm2 + position-wise FFN (bf16 matmuls, f32 accumulate) ----
    h2 = _layer_norm(x1, ln2g_ref[...], ln2b_ref[...], c_real)
    h2 = jnp.dot(h2.astype(jnp.bfloat16), w1_ref[...],
                 preferred_element_type=jnp.float32) + b1_ref[...]
    h2 = jnp.maximum(h2, 0.0)
    h2 = jnp.dot(h2.astype(jnp.bfloat16), w2_ref[...],
                 preferred_element_type=jnp.float32) + b2_ref[...]

    o_ref[0] = (h2 + x1).astype(o_ref.dtype)             # residual 2


def lconv_block(x, params, *, kernel_size, wshare=8, t_tile=256):
    """Fused LConvBlock forward (inference, mask=None)."""
    assert kernel_size % 2 == 1
    B, T, C = x.shape
    assert C % wshare == 0
    K = kernel_size
    P = K // 2

    Cp = _round_up(C, 128)                 # lane-aligned channel count
    TT = min(t_tile, _round_up(T, 8))      # time tile (multiple of 8)
    NT = (T + TT - 1) // TT
    Tpad = NT * TT
    TH = TT + 2 * P                        # halo'd tile length

    f32, bf16 = jnp.float32, jnp.bfloat16

    # --- zero-pad channels/time and build overlapping halo windows of x ----
    x_pad = jnp.pad(x.astype(f32), ((0, 0), (P, Tpad - T + P), (0, Cp - C)))
    widx = jnp.arange(NT)[:, None] * TT + jnp.arange(TH)[None, :]   # (NT, TH)
    x_halo = x_pad[:, widx, :]                                      # (B, NT, TH, Cp)

    def pad_vec(v, n):                      # (m,) -> (1, n) f32
        return jnp.pad(v.astype(f32), (0, n - v.shape[0])).reshape(1, n)

    def pad_mat(w, r, c, dt):               # (a, b) -> (r, c)
        return jnp.pad(w.astype(f32),
                       ((0, r - w.shape[0]), (0, c - w.shape[1]))).astype(dt)

    ln1_g = pad_vec(params["ln1_g"], Cp)
    ln1_b = pad_vec(params["ln1_b"], Cp)
    ln2_g = pad_vec(params["ln2_g"], Cp)
    ln2_b = pad_vec(params["ln2_b"], Cp)

    # Fused GLU weight: value half in cols [0, Cp), gate half in cols [Cp, 2Cp).
    glu_w = jnp.concatenate(
        [pad_mat(params["glu_w"][:, :C], Cp, Cp, bf16),
         pad_mat(params["glu_w"][:, C:], Cp, Cp, bf16)], axis=1)      # (Cp, 2Cp)
    glu_b = jnp.concatenate(
        [pad_vec(params["glu_b"][:C], Cp), pad_vec(params["glu_b"][C:], Cp)],
        axis=1)                                                       # (1, 2Cp)

    # LConv kernel: softmax over taps precomputed; channel c uses head c % wshare.
    w_heads = jax.nn.softmax(params["lconv_w"].astype(f32), axis=-1)  # (wshare, K)
    lconv_w = jnp.tile(w_heads.T, (1, C // wshare))                   # (K, C)
    lconv_w = jnp.pad(lconv_w, ((0, 0), (0, Cp - C)))                 # (K, Cp)

    fc1_w = pad_mat(params["fc1_w"], Cp, 4 * Cp, bf16)
    fc1_b = pad_vec(params["fc1_b"], 4 * Cp)
    fc2_w = pad_mat(params["fc2_w"], 4 * Cp, Cp, bf16)
    fc2_b = pad_vec(params["fc2_b"], Cp)

    kern = functools.partial(lconv_block_kernel, kernel_size=K, t_tile=TT,
                             t_real=T, c_real=C)

    def fixed(shape):
        # Block index never changes across the grid -> weights are fetched once.
        # TODO(synk): pipeline_mode=pl.Buffered(1) would also drop the second
        # weight buffer on VMEM-tight chips (v7x / v5e).
        zeros = (0,) * len(shape)
        return pl.BlockSpec(shape, lambda b, t, _z=zeros: _z)

    out = pl.pallas_call(
        kern,
        out_shape=jax.ShapeDtypeStruct((B, Tpad, Cp), x.dtype),
        grid_spec=pltpu.PrefetchScalarGridSpec(
            num_scalar_prefetch=0,
            grid=(B, NT),
            in_specs=[
                pl.BlockSpec((1, 1, TH, Cp), lambda b, t: (b, t, 0, 0)),  # x halo
                fixed((1, Cp)), fixed((1, Cp)),            # ln1 gamma / beta
                fixed((Cp, 2 * Cp)), fixed((1, 2 * Cp)),   # fused GLU W / b
                fixed((K, Cp)),                            # lconv softmax kernel
                fixed((1, Cp)), fixed((1, Cp)),            # ln2 gamma / beta
                fixed((Cp, 4 * Cp)), fixed((1, 4 * Cp)),   # fc1 W / b
                fixed((4 * Cp, Cp)), fixed((1, Cp)),       # fc2 W / b
            ],
            out_specs=pl.BlockSpec((1, TT, Cp), lambda b, t: (b, t, 0)),
        ),
        compiler_params=pltpu.CompilerParams(
            dimension_semantics=("parallel", "parallel"),
            vmem_limit_bytes=48 * 1024 * 1024),
    )(x_halo, ln1_g, ln1_b, glu_w, glu_b, lconv_w,
      ln2_g, ln2_b, fc1_w, fc1_b, fc2_w, fc2_b)

    return out[:, :T, :C]


def init_params(key, dim, kernel_size, wshare=8):
    assert dim % wshare == 0 and kernel_size % 2 == 1
    ks = jax.random.split(key, 7)
    f32 = jnp.float32

    def lin(k, fan_in, shape):
        return (jax.random.uniform(k, shape, f32) - 0.5) * (2.0 / jnp.sqrt(fan_in))

    return {
        "ln1_g": jnp.ones((dim,), f32), "ln1_b": jnp.zeros((dim,), f32),
        "glu_w": lin(ks[0], dim, (dim, 2 * dim)),        # == torch glu_fc.weight.T
        "glu_b": lin(ks[1], dim, (2 * dim,)),
        "lconv_w": jax.random.uniform(ks[2], (wshare, kernel_size), f32),  # U(0,1)
        "ln2_g": jnp.ones((dim,), f32), "ln2_b": jnp.zeros((dim,), f32),
        "fc1_w": lin(ks[3], dim, (dim, 4 * dim)), "fc1_b": lin(ks[4], dim, (4 * dim,)),
        "fc2_w": lin(ks[5], 4 * dim, (4 * dim, dim)), "fc2_b": lin(ks[6], 4 * dim, (dim,)),
    }


if __name__ == "__main__":
    B, T, DIM, KSIZE = 2, 16, 32, 3
    key = jax.random.PRNGKey(0)
    kx, kp = jax.random.split(key)
    x = jax.random.normal(kx, (B, T, DIM), jnp.float32)
    params = init_params(kp, DIM, KSIZE)

    out = lconv_block(x, params, kernel_size=KSIZE)
    out = jax.block_until_ready(out)
    assert out.shape == (B, T, DIM)
    assert bool(jnp.all(jnp.isfinite(out)))
    print("KERNEL_OK")
</pallas_src>

<mosaic_0001>
module attributes {stable_mosaic.version = 11 : i64} {
  func.func @lconv_block_kernel(%arg0: i32, %arg1: i32, %arg2: memref<1x1x18x128xf32, #tpu.memory_space<vmem>>, %arg3: memref<1x128xf32, #tpu.memory_space<vmem>>, %arg4: memref<1x128xf32, #tpu.memory_space<vmem>>, %arg5: memref<128x256xbf16, #tpu.memory_space<vmem>>, %arg6: memref<1x256xf32, #tpu.memory_space<vmem>>, %arg7: memref<3x128xf32, #tpu.memory_space<vmem>>, %arg8: memref<1x128xf32, #tpu.memory_space<vmem>>, %arg9: memref<1x128xf32, #tpu.memory_space<vmem>>, %arg10: memref<128x512xbf16, #tpu.memory_space<vmem>>, %arg11: memref<1x512xf32, #tpu.memory_space<vmem>>, %arg12: memref<512x128xbf16, #tpu.memory_space<vmem>>, %arg13: memref<1x128xf32, #tpu.memory_space<vmem>>, %arg14: memref<1x16x128xf32, #tpu.memory_space<vmem>>) attributes {dimension_semantics = [#tpu.dimension_semantics<parallel>, #tpu.dimension_semantics<parallel>], iteration_bounds = array<i64: 2, 1>, scalar_prefetch = 0 : i64, scratch_operands = 0 : i64, tpu.core_type = #tpu.core_type<tc>, window_params = [{transform_indices = @transform_0, window_bounds = array<i64: 1, 1, 18, 128>}, {pipeline_mode = #tpu.pipeline_mode<synchronous>, transform_indices = @transform_1, window_bounds = array<i64: 1, 128>}, {pipeline_mode = #tpu.pipeline_mode<synchronous>, transform_indices = @transform_2, window_bounds = array<i64: 1, 128>}, {pipeline_mode = #tpu.pipeline_mode<synchronous>, transform_indices = @transform_3, window_bounds = array<i64: 128, 256>}, {pipeline_mode = #tpu.pipeline_mode<synchronous>, transform_indices = @transform_4, window_bounds = array<i64: 1, 256>}, {pipeline_mode = #tpu.pipeline_mode<synchronous>, transform_indices = @transform_5, window_bounds = array<i64: 3, 128>}, {pipeline_mode = #tpu.pipeline_mode<synchronous>, transform_indices = @transform_6, window_bounds = array<i64: 1, 128>}, {pipeline_mode = #tpu.pipeline_mode<synchronous>, transform_indices = @transform_7, window_bounds = array<i64: 1, 128>}, {pipeline_mode = #tpu.pipeline_mode<synchronous>, transform_indices = @transform_8, window_bounds = array<i64: 128, 512>}, {pipeline_mode = #tpu.pipeline_mode<synchronous>, transform_indices = @transform_9, window_bounds = array<i64: 1, 512>}, {pipeline_mode = #tpu.pipeline_mode<synchronous>, transform_indices = @transform_10, window_bounds = array<i64: 512, 128>}, {pipeline_mode = #tpu.pipeline_mode<synchronous>, transform_indices = @transform_11, window_bounds = array<i64: 1, 128>}, {transform_indices = @transform_12, window_bounds = array<i64: 1, 16, 128>}]} {
    %c0 = arith.constant 0 : index
    %c0_0 = arith.constant 0 : index
    %c0_1 = arith.constant 0 : index
    %c0_2 = arith.constant 0 : index
    %0 = vector.load %arg2[%c0, %c0_0, %c0_1, %c0_2] : memref<1x1x18x128xf32, #tpu.memory_space<vmem>>, vector<1x1x18x128xf32>
    %1 = vector.shape_cast %0 : vector<1x1x18x128xf32> to vector<18x128xf32>
    %c16_i32 = arith.constant 16 : i32
    %2 = arith.muli %arg1, %c16_i32 : i32
    %3 = tpu.iota {dimensions = array<i32: 0>} : vector<18x1xi32>
    %4 = vector.broadcast %2 : i32 to vector<18x1xi32>
    %5 = arith.addi %3, %4 : vector<18x1xi32>
    %c1_i32 = arith.constant 1 : i32
    %6 = vector.broadcast %c1_i32 : i32 to vector<18x1xi32>
    %7 = arith.subi %5, %6 : vector<18x1xi32>
    %c0_i32 = arith.constant 0 : i32
    %8 = vector.broadcast %c0_i32 : i32 to vector<18x1xi32>
    %9 = arith.cmpi sge, %7, %8 : vector<18x1xi32>
    %c16_i32_3 = arith.constant 16 : i32
    %10 = vector.broadcast %c16_i32_3 : i32 to vector<18x1xi32>
    %11 = arith.cmpi slt, %7, %10 : vector<18x1xi32>
    %12 = arith.andi %9, %11 : vector<18x1xi1>
    %13 = arith.extui %12 : vector<18x1xi1> to vector<18x1xi32>
    %14 = arith.sitofp %13 : vector<18x1xi32> to vector<18x1xf32>
    %c0_4 = arith.constant 0 : index
    %c0_5 = arith.constant 0 : index
    %15 = vector.load %arg3[%c0_4, %c0_5] : memref<1x128xf32, #tpu.memory_space<vmem>>, vector<1x128xf32>
    %c0_6 = arith.constant 0 : index
    %c0_7 = arith.constant 0 : index
    %16 = vector.load %arg4[%c0_6, %c0_7] : memref<1x128xf32, #tpu.memory_space<vmem>>, vector<1x128xf32>
    %cst = arith.constant dense<0.000000e+00> : vector<18xf32>
    %17 = vector.multi_reduction <add>, %1, %cst [1] : vector<18x128xf32> to vector<18xf32>
    %18 = vector.shape_cast %17 : vector<18xf32> to vector<18x1xf32>
    %19 = arith.mulf %1, %1 : vector<18x128xf32>
    %cst_8 = arith.constant dense<0.000000e+00> : vector<18xf32>
    %20 = vector.multi_reduction <add>, %19, %cst_8 [1] : vector<18x128xf32> to vector<18xf32>
    %21 = vector.shape_cast %20 : vector<18xf32> to vector<18x1xf32>
    %cst_9 = arith.constant 3.125000e-02 : f32
    %22 = vector.broadcast %cst_9 : f32 to vector<18x1xf32>
    %23 = arith.mulf %18, %22 : vector<18x1xf32>
    %cst_10 = arith.constant 3.125000e-02 : f32
    %24 = vector.broadcast %cst_10 : f32 to vector<18x1xf32>
    %25 = arith.mulf %21, %24 : vector<18x1xf32>
    %26 = arith.mulf %23, %23 : vector<18x1xf32>
    %27 = arith.subf %25, %26 : vector<18x1xf32>
    %28 = vector.broadcast %23 : vector<18x1xf32> to vector<18x128xf32>
    %29 = arith.subf %1, %28 : vector<18x128xf32>
    %cst_11 = arith.constant 9.99999974E-6 : f32
    %30 = vector.broadcast %cst_11 : f32 to vector<18x1xf32>
    %31 = arith.addf %27, %30 : vector<18x1xf32>
    %32 = math.rsqrt %31 : vector<18x1xf32>
    %33 = vector.broadcast %32 : vector<18x1xf32> to vector<18x128xf32>
    %34 = arith.mulf %29, %33 : vector<18x128xf32>
    %35 = vector.broadcast %15 : vector<1x128xf32> to vector<18x128xf32>
    %36 = arith.mulf %34, %35 : vector<18x128xf32>
    %37 = vector.broadcast %16 : vector<1x128xf32> to vector<18x128xf32>
    %38 = arith.addf %36, %37 : vector<18x128xf32>
    %39 = arith.truncf %38 : vector<18x128xf32> to vector<18x128xbf16>
    %c0_12 = arith.constant 0 : index
    %c0_13 = arith.constant 0 : index
    %40 = vector.load %arg5[%c0_12, %c0_13] : memref<128x256xbf16, #tpu.memory_space<vmem>>, vector<128x256xbf16>
    %cst_14 = arith.constant dense<0.000000e+00> : vector<18x256xf32>
    %41 = tpu.matmul %39, %40, %cst_14 {dimension_numbers = #tpu.dot_dimension_numbers<[1], [0], [0], [1], [0, 0, 1, 1], [], []>} : vector<18x128xbf16>, vector<128x256xbf16>, vector<18x256xf32> -> vector<18x256xf32>
    %c0_15 = arith.constant 0 : index
    %c0_16 = arith.constant 0 : index
    %42 = vector.load %arg6[%c0_15, %c0_16] : memref<1x256xf32, #tpu.memory_space<vmem>>, vector<1x256xf32>
    %43 = vector.broadcast %42 : vector<1x256xf32> to vector<18x256xf32>
    %44 = arith.addf %41, %43 : vector<18x256xf32>
    %45 = vector.extract_strided_slice %44 {offsets = [0, 128], sizes = [18, 128], strides = [1, 1]} : vector<18x256xf32> to vector<18x128xf32>
    %cst_17 = arith.constant 0.000000e+00 : f32
    %46 = vector.broadcast %cst_17 : f32 to vector<18x128xf32>
    %47 = arith.subf %46, %45 : vector<18x128xf32>
    %48 = math.exp %47 : vector<18x128xf32>
    %cst_18 = arith.constant 1.000000e+00 : f32
    %49 = vector.broadcast %cst_18 : f32 to vector<18x128xf32>
    %50 = arith.addf %49, %48 : vector<18x128xf32>
    %51 = tpu.reciprocal %50 {approx = true} : vector<18x128xf32> -> vector<18x128xf32>
    %52 = vector.extract_strided_slice %44 {offsets = [0, 0], sizes = [18, 128], strides = [1, 1]} : vector<18x256xf32> to vector<18x128xf32>
    %53 = arith.mulf %52, %51 : vector<18x128xf32>
    %54 = vector.broadcast %14 : vector<18x1xf32> to vector<18x128xf32>
    %55 = arith.mulf %53, %54 : vector<18x128xf32>
    %c0_19 = arith.constant 0 : index
    %c0_20 = arith.constant 0 : index
    %56 = vector.load %arg7[%c0_19, %c0_20] : memref<3x128xf32, #tpu.memory_space<vmem>>, vector<3x128xf32>
    %57 = vector.extract_strided_slice %56 {offsets = [0, 0], sizes = [1, 128], strides = [1, 1]} : vector<3x128xf32> to vector<1x128xf32>
    %58 = vector.extract_strided_slice %55 {offsets = [0, 0], sizes = [16, 128], strides = [1, 1]} : vector<18x128xf32> to vector<16x128xf32>
    %59 = vector.broadcast %57 : vector<1x128xf32> to vector<16x128xf32>
    %60 = arith.mulf %59, %58 : vector<16x128xf32>
    %61 = vector.extract_strided_slice %56 {offsets = [1, 0], sizes = [1, 128], strides = [1, 1]} : vector<3x128xf32> to vector<1x128xf32>
    %62 = vector.extract_strided_slice %55 {offsets = [1, 0], sizes = [16, 128], strides = [1, 1]} : vector<18x128xf32> to vector<16x128xf32>
    %63 = vector.broadcast %61 : vector<1x128xf32> to vector<16x128xf32>
    %64 = arith.mulf %63, %62 : vector<16x128xf32>
    %65 = arith.addf %60, %64 : vector<16x128xf32>
    %66 = vector.extract_strided_slice %56 {offsets = [2, 0], sizes = [1, 128], strides = [1, 1]} : vector<3x128xf32> to vector<1x128xf32>
    %67 = vector.extract_strided_slice %55 {offsets = [2, 0], sizes = [16, 128], strides = [1, 1]} : vector<18x128xf32> to vector<16x128xf32>
    %68 = vector.broadcast %66 : vector<1x128xf32> to vector<16x128xf32>
    %69 = arith.mulf %68, %67 : vector<16x128xf32>
    %70 = arith.addf %65, %69 : vector<16x128xf32>
    %71 = vector.extract_strided_slice %1 {offsets = [1, 0], sizes = [16, 128], strides = [1, 1]} : vector<18x128xf32> to vector<16x128xf32>
    %72 = arith.addf %70, %71 : vector<16x128xf32>
    %c0_21 = arith.constant 0 : index
    %c0_22 = arith.constant 0 : index
    %73 = vector.load %arg8[%c0_21, %c0_22] : memref<1x128xf32, #tpu.memory_space<vmem>>, vector<1x128xf32>
    %c0_23 = arith.constant 0 : index
    %c0_24 = arith.constant 0 : index
    %74 = vector.load %arg9[%c0_23, %c0_24] : memref<1x128xf32, #tpu.memory_space<vmem>>, vector<1x128xf32>
    %cst_25 = arith.constant dense<0.000000e+00> : vector<16xf32>
    %75 = vector.multi_reduction <add>, %72, %cst_25 [1] : vector<16x128xf32> to vector<16xf32>
    %76 = vector.shape_cast %75 : vector<16xf32> to vector<16x1xf32>
    %77 = arith.mulf %72, %72 : vector<16x128xf32>
    %cst_26 = arith.constant dense<0.000000e+00> : vector<16xf32>
    %78 = vector.multi_reduction <add>, %77, %cst_26 [1] : vector<16x128xf32> to vector<16xf32>
    %79 = vector.shape_cast %78 : vector<16xf32> to vector<16x1xf32>
    %cst_27 = arith.constant 3.125000e-02 : f32
    %80 = vector.broadcast %cst_27 : f32 to vector<16x1xf32>
    %81 = arith.mulf %76, %80 : vector<16x1xf32>
    %cst_28 = arith.constant 3.125000e-02 : f32
    %82 = vector.broadcast %cst_28 : f32 to vector<16x1xf32>
    %83 = arith.mulf %79, %82 : vector<16x1xf32>
    %84 = arith.mulf %81, %81 : vector<16x1xf32>
    %85 = arith.subf %83, %84 : vector<16x1xf32>
    %86 = vector.broadcast %81 : vector<16x1xf32> to vector<16x128xf32>
    %87 = arith.subf %72, %86 : vector<16x128xf32>
    %cst_29 = arith.constant 9.99999974E-6 : f32
    %88 = vector.broadcast %cst_29 : f32 to vector<16x1xf32>
    %89 = arith.addf %85, %88 : vector<16x1xf32>
    %90 = math.rsqrt %89 : vector<16x1xf32>
    %91 = vector.broadcast %90 : vector<16x1xf32> to vector<16x128xf32>
    %92 = arith.mulf %87, %91 : vector<16x128xf32>
    %93 = vector.broadcast %73 : vector<1x128xf32> to vector<16x128xf32>
    %94 = arith.mulf %92, %93 : vector<16x128xf32>
    %95 = vector.broadcast %74 : vector<1x128xf32> to vector<16x128xf32>
    %96 = arith.addf %94, %95 : vector<16x128xf32>
    %97 = arith.truncf %96 : vector<16x128xf32> to vector<16x128xbf16>
    %c0_30 = arith.constant 0 : index
    %c0_31 = arith.constant 0 : index
    %98 = vector.load %arg10[%c0_30, %c0_31] : memref<128x512xbf16, #tpu.memory_space<vmem>>, vector<128x512xbf16>
    %cst_32 = arith.constant dense<0.000000e+00> : vector<16x512xf32>
    %99 = tpu.matmul %97, %98, %cst_32 {dimension_numbers = #tpu.dot_dimension_numbers<[1], [0], [0], [1], [0, 0, 1, 1], [], []>} : vector<16x128xbf16>, vector<128x512xbf16>, vector<16x512xf32> -> vector<16x512xf32>
    %c0_33 = arith.constant 0 : index
    %c0_34 = arith.constant 0 : index
    %100 = vector.load %arg11[%c0_33, %c0_34] : memref<1x512xf32, #tpu.memory_space<vmem>>, vector<1x512xf32>
    %101 = vector.broadcast %100 : vector<1x512xf32> to vector<16x512xf32>
    %102 = arith.addf %99, %101 : vector<16x512xf32>
    %cst_35 = arith.constant 0.000000e+00 : f32
    %103 = vector.broadcast %cst_35 : f32 to vector<16x512xf32>
    %104 = arith.maximumf %102, %103 : vector<16x512xf32>
    %105 = arith.truncf %104 : vector<16x512xf32> to vector<16x512xbf16>
    %c0_36 = arith.constant 0 : index
    %c0_37 = arith.constant 0 : index
    %106 = vector.load %arg12[%c0_36, %c0_37] : memref<512x128xbf16, #tpu.memory_space<vmem>>, vector<512x128xbf16>
    %cst_38 = arith.constant dense<0.000000e+00> : vector<16x128xf32>
    %107 = tpu.matmul %105, %106, %cst_38 {dimension_numbers = #tpu.dot_dimension_numbers<[1], [0], [0], [1], [0, 0, 1, 1], [], []>} : vector<16x512xbf16>, vector<512x128xbf16>, vector<16x128xf32> -> vector<16x128xf32>
    %c0_39 = arith.constant 0 : index
    %c0_40 = arith.constant 0 : index
    %108 = vector.load %arg13[%c0_39, %c0_40] : memref<1x128xf32, #tpu.memory_space<vmem>>, vector<1x128xf32>
    %109 = vector.broadcast %108 : vector<1x128xf32> to vector<16x128xf32>
    %110 = arith.addf %107, %109 : vector<16x128xf32>
    %111 = arith.addf %110, %72 : vector<16x128xf32>
    %c0_41 = arith.constant 0 : index
    %c0_42 = arith.constant 0 : index
    %c0_43 = arith.constant 0 : index
    %112 = vector.load %arg14[%c0_41, %c0_42, %c0_43] : memref<1x16x128xf32, #tpu.memory_space<vmem>>, vector<1x16x128xf32>
    %113 = vector.shape_cast %112 : vector<1x16x128xf32> to vector<16x128xf32>
    %114 = vector.shape_cast %111 : vector<16x128xf32> to vector<1x16x128xf32>
    tpu.vector_store %arg14[%c0_41, %c0_42, %c0_43], %114 {strides = array<i32>} : memref<1x16x128xf32, #tpu.memory_space<vmem>>, vector<1x16x128xf32>,
    return
  }
  func.func @transform_0(%arg0: i32, %arg1: i32) -> (i32, i32, i32, i32) {
    %c0_i32 = arith.constant 0 : i32
    %c0_i32_0 = arith.constant 0 : i32
    %c0_i32_1 = arith.constant 0 : i32
    return %arg0, %arg1, %c0_i32, %c0_i32_0 : i32, i32, i32, i32
  }
  func.func @transform_1(%arg0: i32, %arg1: i32) -> (i32, i32) {
    %c0_i32 = arith.constant 0 : i32
    %c0_i32_0 = arith.constant 0 : i32
    %c0_i32_1 = arith.constant 0 : i32
    return %c0_i32, %c0_i32_0 : i32, i32
  }
  func.func @transform_2(%arg0: i32, %arg1: i32) -> (i32, i32) {
    %c0_i32 = arith.constant 0 : i32
    %c0_i32_0 = arith.constant 0 : i32
    %c0_i32_1 = arith.constant 0 : i32
    return %c0_i32, %c0_i32_0 : i32, i32
  }
  func.func @transform_3(%arg0: i32, %arg1: i32) -> (i32, i32) {
    %c0_i32 = arith.constant 0 : i32
    %c0_i32_0 = arith.constant 0 : i32
    %c0_i32_1 = arith.constant 0 : i32
    return %c0_i32, %c0_i32_0 : i32, i32
  }
  func.func @transform_4(%arg0: i32, %arg1: i32) -> (i32, i32) {
    %c0_i32 = arith.constant 0 : i32
    %c0_i32_0 = arith.constant 0 : i32
    %c0_i32_1 = arith.constant 0 : i32
    return %c0_i32, %c0_i32_0 : i32, i32
  }
  func.func @transform_5(%arg0: i32, %arg1: i32) -> (i32, i32) {
    %c0_i32 = arith.constant 0 : i32
    %c0_i32_0 = arith.constant 0 : i32
    %c0_i32_1 = arith.constant 0 : i32
    return %c0_i32, %c0_i32_0 : i32, i32
  }
  func.func @transform_6(%arg0: i32, %arg1: i32) -> (i32, i32) {
    %c0_i32 = arith.constant 0 : i32
    %c0_i32_0 = arith.constant 0 : i32
    %c0_i32_1 = arith.constant 0 : i32
    return %c0_i32, %c0_i32_0 : i32, i32
  }
  func.func @transform_7(%arg0: i32, %arg1: i32) -> (i32, i32) {
    %c0_i32 = arith.constant 0 : i32
    %c0_i32_0 = arith.constant 0 : i32
    %c0_i32_1 = arith.constant 0 : i32
    return %c0_i32, %c0_i32_0 : i32, i32
  }
  func.func @transform_8(%arg0: i32, %arg1: i32) -> (i32, i32) {
    %c0_i32 = arith.constant 0 : i32
    %c0_i32_0 = arith.constant 0 : i32
    %c0_i32_1 = arith.constant 0 : i32
    return %c0_i32, %c0_i32_0 : i32, i32
  }
  func.func @transform_9(%arg0: i32, %arg1: i32) -> (i32, i32) {
    %c0_i32 = arith.constant 0 : i32
    %c0_i32_0 = arith.constant 0 : i32
    %c0_i32_1 = arith.constant 0 : i32
    return %c0_i32, %c0_i32_0 : i32, i32
  }
  func.func @transform_10(%arg0: i32, %arg1: i32) -> (i32, i32) {
    %c0_i32 = arith.constant 0 : i32
    %c0_i32_0 = arith.constant 0 : i32
    %c0_i32_1 = arith.constant 0 : i32
    return %c0_i32, %c0_i32_0 : i32, i32
  }
  func.func @transform_11(%arg0: i32, %arg1: i32) -> (i32, i32) {
    %c0_i32 = arith.constant 0 : i32
    %c0_i32_0 = arith.constant 0 : i32
    %c0_i32_1 = arith.constant 0 : i32
    return %c0_i32, %c0_i32_0 : i32, i32
  }
  func.func @transform_12(%arg0: i32, %arg1: i32) -> (i32, i32, i32) {
    %c0_i32 = arith.constant 0 : i32
    %c0_i32_0 = arith.constant 0 : i32
    return %arg0, %arg1, %c0_i32 : i32, i32, i32
  }
}

</mosaic_0001>

<bundles_post_ra>
// kernel: tpu_custom_call.1
= control target key start
LH: loop header
LB: loop body
LE: loop exit
PB: predicated region body
PF: predicated region fallthrough
CT: control target
= control target key end

     0   :  { %s2569_s0 = inlined_call_operand.vmem [shape: f32[2,1,18,128], index: 0, kind: input, shape index: {}]   ;;  %s2570_s1 = inlined_call_operand.vmem [shape: f32[1,128], index: 1, kind: input, shape index: {}]   ;;  %s2571_s2 = inlined_call_operand.vmem [shape: f32[1,128], index: 2, kind: input, shape index: {}]   ;;  %s2572_s3 = inlined_call_operand.hbm [shape: bf16[128,256], index: 3, kind: input, shape index: {}]   ;;  %s2573_s4 = inlined_call_operand.vmem [shape: f32[1,256], index: 4, kind: input, shape index: {}]   ;;  %s2574_s5 = inlined_call_operand.vmem [shape: f32[3,128], index: 5, kind: input, shape index: {}]   ;;  %s2575_s6 = inlined_call_operand.vmem [shape: f32[1,128], index: 6, kind: input, shape index: {}]   ;;  %s2576_s7 = inlined_call_operand.vmem [shape: f32[1,128], index: 7, kind: input, shape index: {}]   ;;  %s2577_s8 = inlined_call_operand.hbm [shape: bf16[128,512], index: 8, kind: input, shape index: {}]   ;;  %s2578_s9 = inlined_call_operand.vmem [shape: f32[1,512], index: 9, kind: input, shape index: {}]   ;;  %s2579_s10 = inlined_call_operand.hbm [shape: bf16[512,128], index: 10, kind: input, shape index: {}]   ;;  %s2580_s11 = inlined_call_operand.vmem [shape: f32[1,128], index: 11, kind: input, shape index: {}]   ;;  %s2581_s12 = inlined_call_operand.hbm [shape: f32[2,16,128], index: 12, kind: output, shape index: {}]  }
   0x1   :  { %2596 = sst [smem:[#allocation20_spill]] %s2577_s8 }
   0x2   :  { %2597 = sst [smem:[#allocation21_spill]] %s2581_s12 }
   0x3   :  { %17 = vsyncpa [#allocation3], 0 }
   0x4   :  { %18 = vsyncpa [#allocation6], 0 }
   0x5   :  { %19 = vsyncpa [#allocation4], 0 }
   0x6   :  { %21 = vsyncpa [#allocation4 + $0x1], 0  ;;  %s2281_s21 = smov 0   ;;  %s2283_s22 = smov 0  }
   0x7   :  { %s2285_s23 = smov 0   ;;  %s2287_s24 = smov 0  }
   0x8   :  { %s2289_s25 = smov 0   ;;  %s2291_s26 = smov 0  }
   0x9 LB: > { %2598 = sst [smem:[#allocation12_spill]] %s2180_s21  ;;  %s1654_s27 = sadd.s32 4294967295, %s2200_s26   ;;  %s2200_s26 = sphi %s2291_s26, %s27_s26   ;;  %s2196_s25 = sphi %s2289_s25, %s2626_s25   ;;  %s2192_s24 = sphi %s2287_s24, %s2625_s24   ;;  %s2188_s23 = sphi %s2285_s23, %s2624_s23   ;;  %s2184_s22 = sphi %s2283_s22, %s2628_s22   ;;  %s2180_s21 = sphi %s2281_s21, %s2627_s21  }
   0xa   : > { %2599 = sst [smem:[#allocation13_spill]] %s2188_s23  ;;  %s1655_s28 = sadd.s32 4294967294, %s2200_s26  }
   0xb   : > { %2600 = sst [smem:[#allocation14_spill]] %s2196_s25  ;;  %s39_s29 = sadd.s32 1, %s2196_s25 }
   0xc   : > { %2601 = sst [smem:[#allocation15_spill]] %s2200_s26  ;;  %s307_s30 = sadd.s32 1, %s2188_s23 }
   0xd   : > { %p41_p0 = scmp.ge.s32.totalorder %s39_s29, 2  ;;  %p317_p1 = scmp.ne.s32.totalorder %s2188_s23, %s2184_s22 }
   0xe   : > { %p318_p2 = scmp.eq.s32.totalorder %s1654_s27, 1  ;;  %p323_p3 = scmp.ne.s32.totalorder %s2184_s22, %s2180_s21 }
   0xf   : > { %s2630_s29 = smov (%p41_p0, %s39_s29), 0  ;;  %p324_p5 = scmp.eq.s32.totalorder %s1655_s28, 1 }
  0x10   : > { %2602 = sst [smem:[#allocation16_spill]] %s2630_s29  ;;  %p2321_p4 = por %p318_p2, %p317_p1 }
  0x11   : > { %s302_s14 = ssub.s32 %s2196_s25, %s2630_s29  ;;  %p1656_p6 = scmp.ge.s32.totalorder %s2200_s26, 1 }
  0x12   : > { %s2603_s13 = scalar_select %p2321_p4, 1, 0 }
  0x13   : > { %p305_p7 = scmp.eq.s32.totalorder %s302_s14, 0  ;;  %p2328_p8 = por %p324_p5, %p323_p3 }
  0x14   : > { %2604 = sst [smem:[#allocation17_spill]] %s2603_s13  ;;  %p331_p9 = scmp.lt.s32.totalorder %s2200_s26, 3 }
  0x15   : > { %s2605_s15 = scalar_select %p2328_p8, 1, 0 }
  0x16   : > { %s2334_s16 = scalar_select %p305_p7, %s2188_s23, %s307_s30  }
  0x17   : > { %2606 = sst [smem:[#allocation18_spill]] %s2605_s15  ;;  %p2336_p10 = pnand %p1656_p6, %p331_p9 }
  0x18   : > { %2607 = sst [smem:[#allocation19_spill]] %s2334_s16  ;;  %p2340_p11 = scmp.eq.s32.totalorder %s1654_s27, 0 }
  0x19   : > { %s2608_s17 = scalar_select %p2336_p10, 1, 0 }
  0x1a   : > { %s2609_s18 = scalar_select %p2340_p11, 1, 0 }
  0x1b   : > { %p1822_p12 = pneg %p2336_p10  ;;  %s2202_s19 = smov [#allocation5]  }
  0x1c   : > { %s374_s20 = sshll.u32 %s2202_s19, 4  ;;  %s2203_s30 = smov [#allocation2]   ;;  %s375_s20 = int_to_ptr.vmem [resolvable:$true] %s374_s20 }
  0x1d   : > { %p2348_p13 = pnand %p2340_p11, %p1822_p12  ;;  %s349_s14 = sshll.u32 %s2203_s30, 4  ;;  %s350_s14 = int_to_ptr.vmem [resolvable:$true] %s349_s14 }
  0x1e   : > { %s2611_s8 = sld [smem:[#allocation20_spill]] }
  0x1f   : > { %p2360_p1 = pneg %p2348_p13 }
  0x24   : > { %s2030_s27 = scalar_lea.hbm %s2611_s8, 4096 }
  0x25   : > { %p2031_p0 = scmp.ne.s32.totalorder %s2611_s8, %s2030_s27  ;;  %p2037_p5 = scmp.lt.u32.totalorder %s2030_s27, %s2611_s8 }
  0x27   : > { %p2033_p2 = pnand %p2360_p1, %p2031_p0 }
  0x29   : > { %p2034_p3 = pneg %p2033_p2 }
  0x2b   : > { %p2039_p6 = pnand %p2037_p5, %p2034_p3 }
  0x2d   : > { %2042 = shalt.err (!%p2039_p6)
}
  0x2e   : > { %s2043_s25 = scalar_lea.vmem %s375_s20, 4096  ;;  %p2051_p8 = scmp.lt.s32.totalorder %s375_s20, %s375_s20 }
  0x2f   : > { %p2044_p7 = scmp.ne.s32.totalorder %s375_s20, %s2043_s25  ;;  %p2052_p4 = scmp.lt.s32.totalorder %s2043_s25, %s2043_s25 }
  0x31   : > { %p2046_p9 = pnand %p2044_p7, %p2360_p1  ;;  %p2053_p11 = por %p2052_p4, %p2051_p8 }
  0x33   : > { %p2047_p12 = pneg %p2046_p9 }
  0x35   : > { %p2054_p10 = pnand %p2053_p11, %p2047_p12 }
  0x37   : > { %2057 = shalt.err (!%p2054_p10)
}
  0x38   : > { %s2204_s23 = smov 256   ;;  %s2205_s29 = smov 16  }
  0x39   : > { %1828 = dma.hbm_to_vmem [thread:$0]  (!%p2348_p13), %s2611_s8, 4096, %s375_s20, [#allocation6], %s2204_s23, %s2204_s23, %s2205_s29  }
  0x3a   : > { %s2058_s27 = scalar_lea.hbm %s2572_s3, 2048 }
  0x3b   : > { %p2059_p4 = scmp.ne.s32.totalorder %s2572_s3, %s2058_s27  ;;  %p2065_p11 = scmp.lt.u32.totalorder %s2058_s27, %s2572_s3 }
  0x3d   : > { %p2061_p8 = pnand %p2059_p4, %p2360_p1 }
  0x3f   : > { %p2062_p10 = pneg %p2061_p8 }
  0x41   : > { %p2067_p0 = pnand %p2065_p11, %p2062_p10 }
  0x43   : > { %2070 = shalt.err (!%p2067_p0)
}
  0x44   : > { %s2071_s21 = scalar_lea.vmem %s350_s14, 2048  ;;  %p2079_p6 = scmp.lt.s32.totalorder %s350_s14, %s350_s14 }
  0x45   : > { %p2072_p2 = scmp.ne.s32.totalorder %s350_s14, %s2071_s21  ;;  %p2080_p7 = scmp.lt.s32.totalorder %s2071_s21, %s2071_s21 }
  0x47   : > { %p2074_p3 = pnand %p2072_p2, %p2360_p1  ;;  %p2081_p9 = por %p2080_p7, %p2079_p6 }
  0x49   : > { %p2075_p5 = pneg %p2074_p3 }
  0x4b   : > { %p2082_p12 = pnand %p2081_p9, %p2075_p5 }
  0x4d   : > { %2085 = shalt.err (!%p2082_p12)
}
  0x4e   : > { %s2206_s12 = smov 128   ;;  %s2207_s26 = smov 8  }
  0x4f   : > { %1825 = dma.hbm_to_vmem [thread:$0]  (!%p2348_p13), %s2572_s3, 2048, %s350_s14, [#allocation3], %s2206_s12, %s2206_s12, %s2207_s26  }
  0x50   : > { %s2208_s23 = smov [#allocation7]   ;;  %s2086_s30 = scalar_lea.hbm %s2579_s10, 4096 }
  0x51   : > { %s390_s29 = sshll.u32 %s2208_s23, 4  ;;  %p2087_p4 = scmp.ne.s32.totalorder %s2579_s10, %s2086_s30  ;;  %s391_s29 = int_to_ptr.vmem [resolvable:$true] %s390_s29 }
  0x52   : > { %p2093_p11 = scmp.lt.u32.totalorder %s2086_s30, %s2579_s10 }
  0x53   : > { %p2089_p8 = pnand %p2087_p4, %p2360_p1 }
  0x55   : > { %p2090_p10 = pneg %p2089_p8 }
  0x57   : > { %p2095_p0 = pnand %p2093_p11, %p2090_p10 }
  0x59   : > { %2098 = shalt.err (!%p2095_p0)
}
  0x5a   : > { %s2099_s14 = scalar_lea.vmem %s391_s29, 4096  ;;  %p2107_p6 = scmp.lt.s32.totalorder %s391_s29, %s391_s29 }
  0x5b   : > { %p2100_p2 = scmp.ne.s32.totalorder %s391_s29, %s2099_s14  ;;  %p2108_p7 = scmp.lt.s32.totalorder %s2099_s14, %s2099_s14 }
  0x5d   : > { %p2102_p3 = pnand %p2100_p2, %p2360_p1  ;;  %p2109_p9 = por %p2108_p7, %p2107_p6 }
  0x5f   : > { %p2103_p5 = pneg %p2102_p3 }
  0x61   : > { %p2110_p12 = pnand %p2109_p9, %p2103_p5 }
  0x63   : > { %2113 = shalt.err (!%p2110_p12)
}
  0x64   : > { %s2209_s12 = smov 64   ;;  %s2210_s26 = smov 4  }
  0x65   : > { %1831 = dma.hbm_to_vmem [thread:$0]  (!%p2348_p13), %s2579_s10, 4096, %s391_s29, [#allocation6], %s2209_s12, %s2209_s12, %s2210_s26  }
  0x66   : > { %p2613_p4 = scmp.ne.s32.totalorder %s2608_s17, 0 }
  0x67   : > { %p2614_p8 = scmp.ne.s32.totalorder (!%p2613_p4), %s2609_s18, 0 }
  0x68   : > { %421 = sbr.rel (%p2613_p4) target bundleno = 1192 (0x4a8), region = 68 }
  0x6f   : > { %2167 = dma.done.wait (%p2614_p8), [#allocation3], 2048  }
  0x70   : > { %2169 = vsyncadd (%p2614_p8), [#allocation3], 4294965248 }
  0x71   : > { %2171 = dma.done.wait (%p2614_p8), [#allocation6], 8192  }
  0x72   : > { %2173 = vsyncadd (%p2614_p8), [#allocation6], 4294959104  ;;  %p475_p1 = scmp.lt.s32.totalorder %s2192_s24, 1  ;;  %v1904_v4 = vld [vmem:[#allocation2 + $0x4] ss:$8 sps:$4 sm:$0xff]   ;;  %vm522_vm0 = vcmask 1041408  }
  0x73   : > { %688 = vmatprep.subr.bf16.mxu0 %v1904_v4  ;;  %v1906_v9 = vld [vmem:[#allocation2] ss:$8 sps:$4 sm:$0xff]   ;;  %v1907_v10 = vld [vmem:[#allocation2 + $0x14] ss:$8 sps:$4 sm:$0xff]   ;;  %v1909_v11 = vld [vmem:[#allocation2 + $0x10] ss:$8 sps:$4 sm:$0xff]   ;;  %v490_v4 = vlaneseq }
  0x74   : > { %s476_s28 = scalar_select %p475_p1, %s2192_s24, 1  ;;  %689 = vmatpush1.bf16.msra.mxu0 %v1906_v9  ;;  %v1910_v12 = vld [vmem:[#allocation2 + $0x24] ss:$8 sps:$4 sm:$0xff]   ;;  %v1912_v13 = vld [vmem:[#allocation2 + $0x20] ss:$8 sps:$4 sm:$0xff]   ;;  %v2211_v23 = vmov 0  }
  0x75   : > { %690 = vmatprep.subr.bf16.mxu0 %v1907_v10  ;;  %v1913_v14 = vld [vmem:[#allocation2 + $0x34] ss:$8 sps:$4 sm:$0xff]   ;;  %v1915_v15 = vld [vmem:[#allocation2 + $0x30] ss:$8 sps:$4 sm:$0xff]   ;;  %v1916_v16 = vld [vmem:[#allocation2 + $0x44] ss:$8 sps:$4 sm:$0xff]   ;;  %720 = vmatprep.mubr.bf16.mxu0 %v2211_v23 }
  0x76   : > { %s1807_s19 = smul.u32 24, %s476_s28  ;;  %v1918_v17 = vld [vmem:[#allocation2 + $0x40] ss:$8 sps:$4 sm:$0xff]   ;;  %v1919_v18 = vld [vmem:[#allocation2 + $0x54] ss:$8 sps:$4 sm:$0xff]   ;;  %1110 = vmatprep.mubr.bf16.mxu1 %v2211_v23  ;;  %vm777_vm3 = vcmask 1046528  }
  0x77   : > { %v1921_v19 = vld [vmem:[#allocation2 + $0x50] ss:$8 sps:$4 sm:$0xff]   ;;  %v1922_v20 = vld [vmem:[#allocation2 + $0x64] ss:$8 sps:$4 sm:$0xff]   ;;  %v1924_v21 = vld [vmem:[#allocation2 + $0x60] ss:$8 sps:$4 sm:$0xff]  }
  0x78   : > { %s483_s23 = scalar_lea.vmem %s2569_s0, %s1807_s19  ;;  %691 = vmatpush1.bf16.msra.mxu0 %v1909_v11  ;;  %v1925_v22 = vld [vmem:[#allocation2 + $0x74] ss:$8 sps:$4 sm:$0xff]   ;;  %v1927_v24 = vld [vmem:[#allocation2 + $0x70] ss:$8 sps:$4 sm:$0xff]   ;;  %vm797_vm4 = vcmask 1045504   ;;  %s472_s19 = sand.u32 1, %s2184_s22  }
  0x79   : > { %v2427_v0 = vld [vmem:[%s483_s23] sm:$0xff]  ;;  %v2429_v1 = vld [vmem:[%s483_s23 + $0x8] sm:$0xff]  ;;  %v2431_v2 = vld [vmem:[%s483_s23 + $0x10] sm:$0x3]  ;;  %692 = vmatprep.subr.bf16.mxu0 %v1910_v12  ;;  %s1665_s20 = sshll.u32 %s472_s19, 4  ;;  %s2615_s18 = sld [smem:[#allocation17_spill]] }
  0x7a   : > { %518 = vadd.xlane.f32.xlu0 %v2427_v0  ;;  %v526_v3 = vmul.f32 %v2427_v0, %v2427_v0  ;;  %v527_v5 = vmul.f32 %v2429_v1, %v2429_v1  ;;  %v528_v6 = vmul.f32 %v2431_v2, %v2431_v2  ;;  %v523_v7 = vsel %vm522_vm0, %v2431_v2, 0.0  ;;  %v1672_v49 = vld [vmem:[%s2570_s1] ss:$0 sm:$0xff]  ;;  %s474_s29 = scalar_lea.vmem [#allocation8], %s1665_s20  ;;  %s1762_s16 = sshll.u32 %s2192_s24, 8 }
  0x7b   : > { %v1673_v54 = vld [vmem:[%s2571_s2] ss:$0 sm:$0xff]  ;;  %s1541_s15 = sshll.u32 %s474_s29, 4  ;;  %s2616_s25 = sld [smem:[#allocation21_spill]]  ;;  %s2515_s15 = int_to_ptr.vmem [resolvable:$true] %s1541_s15 }
  0x7c   : > { %529 = vadd.xlane.f32.xlu1 %v526_v3  ;;  %v533_v8 = vsel %vm522_vm0, %v528_v6, 0.0  ;;  %693 = vmatpush1.bf16.msra.mxu0 %v1912_v13  ;;  %s2523_s12 = scalar_lea.sflag [#allocation4], %s472_s19  ;;  %s2114_s24 = scalar_lea.vmem %s2515_s15, 256 }
  0x7d   : > { %694 = vmatprep.subr.bf16.mxu0 %v1913_v14  ;;  %p2115_p13 = scmp.ne.s32.totalorder %s2515_s15, %s2114_s24  ;;  %s2213_s26 = smov [#allocation8]  }
  0x7e   : > { %520 = vadd.xlane.f32.xlu0 %v2429_v1  ;;  %s2118_s13 = sshll.u32 %s2213_s26, 4  ;;  %s2119_s13 = int_to_ptr.vmem [resolvable:$false] %s2118_s13 }
  0x7f   : > { %p2618_p10 = scmp.ne.s32.totalorder %s2615_s18, 0  ;;  %s2120_s8 = scalar_lea.vmem %s2119_s13, 512 }
  0x80   : > { %531 = vadd.xlane.f32.xlu1 %v527_v5  ;;  %695 = vmatpush1.bf16.msra.mxu0 %v1915_v15  ;;  %v2451_v5 = vshrl.u32 %v490_v4, 7  ;;  %p2121_p2 = scmp.lt.s32.totalorder %s2515_s15, %s2119_s13  ;;  %p2122_p3 = scmp.lt.s32.totalorder %s2120_s8, %s2114_s24 }
  0x81   : > { %696 = vmatprep.subr.bf16.mxu0 %v1916_v16  ;;  %s2617_s14 = smov %s2616_s25  ;;  %s2521_s21 = scalar_lea.hbm %s2616_s25, %s1762_s16 }
  0x82   : > { %524 = vadd.xlane.f32.xlu0 %v523_v7  ;;  %v2454_v6 = vsub.s32 1, %v2451_v5  ;;  %v596_v7 = vld [vmem:[%s2573_s4] sm:$0x3]  ;;  %p2116_p11 = pnand %p2115_p13, %p2618_p10  ;;  %p2123_p5 = por %p2122_p3, %p2121_p2 }
  0x84   : > { %534 = vadd.xlane.f32.xlu1 %v533_v8  ;;  %697 = vmatpush1.bf16.msra.mxu0 %v1918_v17  ;;  %v605_v8 = vrot.slane %v596_v7, %v2454_v6  ;;  %p2117_p0 = pneg %p2116_p11 }
  0x85   : > { %698 = vmatprep.subr.bf16.mxu0 %v1919_v18 }
  0x86   : > { %p2124_p6 = pnand %p2123_p5, %p2117_p0 }
  0x88   : > { %699 = vmatpush1.bf16.msra.mxu0 %v1921_v19 }
  0x89   : > { %700 = vmatprep.subr.bf16.mxu0 %v1922_v20 }
  0x8c   : > { %701 = vmatpush1.bf16.msra.mxu0 %v1924_v21 }
  0x8d   : > { %702 = vmatprep.subr.bf16.mxu0 %v1925_v22 }
  0x90   : > { %703 = vmatpush1.bf16.msra.mxu0 %v1927_v24 }
 0x107   : > { %v519_v25 = vpop.xlane.xlu0 %518 }
 0x108   : > { %v536_v26 = vmul.f32 0.03125, %v519_v25 }
 0x109   : > { %v530_v27 = vpop.xlane.xlu1 %529 }
 0x10a   : > { %v542_v28 = vmul.f32 %v536_v26, %v536_v26  ;;  %v539_v29 = vmul.f32 0.03125, %v530_v27  ;;  %v548_v46 = vsub.f32 %v2427_v0, %v536_v26 }
 0x10b   : > { %v521_v30 = vpop.xlane.xlu0 %520 }
 0x10c   : > { %v545_v31 = vsub.f32 %v539_v29, %v542_v28  ;;  %v537_v32 = vmul.f32 0.03125, %v521_v30  ;;  %v2461_v30 = vsub.s32 0, %v2451_v5 }
 0x10d   : > { %v532_v33 = vpop.xlane.xlu1 %531 }
 0x10e   : > { %v551_v34 = vadd.f32 1e-05, %v545_v31  ;;  %v543_v35 = vmul.f32 %v537_v32, %v537_v32  ;;  %v540_v36 = vmul.f32 0.03125, %v532_v33  ;;  %v549_v50 = vsub.f32 %v2429_v1, %v537_v32 }
 0x10f   : > { %v525_v37 = vpop.xlane.xlu0 %524  ;;  %v1667_v31 = vadd.s32 4294967295, %v2451_v5  ;;  %v601_v33 = vrot.slane %v596_v7, %v2461_v30 }
 0x110   : > { %2008 = vrsqrt.f32 %v551_v34  ;;  %v546_v38 = vsub.f32 %v540_v36, %v543_v35  ;;  %v538_v39 = vmul.f32 0.03125, %v525_v37  ;;  %v789_v34 = vsub.s32 2, %v2451_v5  ;;  %v760_v36 = vld [vmem:[%s2574_s5] sm:$0x7] }
 0x111   : > { %v535_v40 = vpop.xlane.xlu1 %534  ;;  %vm501_vm1 = vcmp.ge.s32.totalorder %v1667_v31, 0  ;;  %v493_v37 = vadd.s32 16, %v2451_v5  ;;  %v1938_v31 = vld [vmem:[#allocation5 + $0x2c] ss:$16 sps:$4 sm:$0xff]  }
 0x112   : > { %v552_v41 = vadd.f32 1e-05, %v546_v38  ;;  %v544_v42 = vmul.f32 %v538_v39, %v538_v39  ;;  %v541_v43 = vmul.f32 0.03125, %v535_v40  ;;  %v550_v55 = vsub.f32 %v2431_v2, %v538_v39 }
 0x113   : > { %v790_v40 = vrot.slane %v760_v36, %v789_v34 }
 0x114   : > { %2010 = vrsqrt.f32 %v552_v41  ;;  %v547_v44 = vsub.f32 %v541_v43, %v544_v42  ;;  %v2212_v41 = vmov 0.0  }
 0x115   : > { %v1670_v42 = vsel %vm501_vm1, 1.0, %v2212_v41 }
 0x116   : > { %v553_v45 = vadd.f32 1e-05, %v547_v44  ;;  %v770_v44 = vrot.slane %v760_v36, %v2454_v6 }
 0x118   : > { %2012 = vrsqrt.f32 %v553_v45 }
 0x11a   : > { %v2009_v47 = vpop.eup %2008 }
 0x11b   : > { %v557_v48 = vmul.f32 %v2009_v47, %v548_v46  ;;  %v1669_v46 = vadd.s32 4294967295, %v493_v37  ;;  %v1942_v37 = vld [vmem:[#allocation5 + $0x48] ss:$16 sps:$4 sm:$0xff]  }
 0x11d   : > { %v566_v53 = vmul.f32 %v1672_v49, %v557_v48  ;;  %vm506_vm2 = vcmp.lt.s32.totalorder %v1669_v46, 16  ;;  %v1957_v46 = vld [vmem:[#allocation5 + $0x80] ss:$16 sps:$4 sm:$0xff]  }
 0x11e   : > { %v2011_v51 = vpop.eup %2010 }
 0x11f   : > { %v558_v52 = vmul.f32 %v2011_v51, %v549_v50  ;;  %v575_v58 = vadd.f32 %v1673_v54, %v566_v53  ;;  %v810_v50 = vrot.slane %v2427_v0, 1  ;;  %v764_v51 = vrot.slane %v760_v36, %v2461_v30  ;;  %v1944_v36 = vld [vmem:[#allocation5 + $0x4c] ss:$16 sps:$4 sm:$0xff]  }
 0x121   : > { %v567_v56 = vmul.f32 %v1672_v49, %v558_v52 }
 0x122   : > { %v2013_v57 = vpop.eup %2012 }
 0x123   : > { %v576_v59 = vadd.f32 %v1673_v54, %v567_v56  ;;  %v559_v60 = vmul.f32 %v2013_v57, %v550_v55  ;;  %v811_v55 = vrot.slane %v2429_v1, 1 }
 0x125   : > { %v578_v61 = vpack.c.bf16 %v576_v59, %v575_v58  ;;  %v568_v62 = vmul.f32 %v1672_v49, %v559_v60 }
 0x127   : > { %721 = vmatmul.mubr.bf16.vlgmr.msra.gmra.mrb[0].mxu0 %v578_v61  ;;  %v577_v63 = vadd.f32 %v1673_v54, %v568_v62 }
 0x128   : > { %730 = vmatprep.mubr.bf16.mxu0 %v2211_v23 }
 0x129   : > { %v579_v3 = vpack.c.bf16 %v577_v63, %v577_v63 }
 0x12f   : > { %731 = vmatmul.mubr.bf16.gmra.mrb[4].mxu0 %v579_v3  ;;  %v1671_v3 = vsel %vm506_vm2, 1.0, %v2212_v41  ;;  %v1948_v41 = vld [vmem:[#allocation5 + $0x68] ss:$16 sps:$4 sm:$0xff]  }
 0x130   : > { %1153 = vmatprep.mubr.bf16.mxu0 %v2211_v23 }
 0x1fa   : > { %v722_v9 = vpop.f32.mrb[0].mxu0 }
 0x1fb   : > { %v724_v10 = vpop.f32.mrb[1].mxu0  ;;  %v723_v38 = vadd.f32 %v722_v9, %v601_v33  ;;  %v812_v9 = vsel %vm777_vm3, %v810_v50, %v811_v55  ;;  %v1963_v50 = vld [vmem:[#allocation5 + $0xa0] ss:$16 sps:$4 sm:$0xff]  }
 0x1fc   : > { %v725_v11 = vadd.f32 %v724_v10, %v605_v8  ;;  %v726_v12 = vpop.f32.mrb[2].mxu0 }
 0x1fd   : > { %v728_v13 = vpop.f32.mrb[3].mxu0  ;;  %v727_v45 = vadd.f32 %v726_v12, %v601_v33 }
 0x1fe   : > { %v739_v14 = vsub.f32 0.0, %v725_v11  ;;  %v729_v15 = vadd.f32 %v728_v13, %v605_v8 }
 0x200   : > { %v742_v16 = vmul.f32 1.442695, %v739_v14  ;;  %v740_v17 = vsub.f32 0.0, %v729_v15  ;;  %v813_v14 = vrot.slane %v2431_v2, 1 }
 0x202   : > { %2014 = vpow2.f32 %v742_v16  ;;  %v744_v18 = vmul.f32 1.442695, %v740_v17  ;;  %v732_v19 = vpop.f32.mrb[4].mxu0 }
 0x203   : > { %v734_v20 = vpop.f32.mrb[5].mxu0  ;;  %v733_v57 = vadd.f32 %v732_v19, %v601_v33  ;;  %v1939_v33 = vld [vmem:[#allocation5 + $0x20] ss:$16 sps:$4 sm:$0xff]  }
 0x204   : > { %2016 = vpow2.f32 %v744_v18  ;;  %v735_v21 = vadd.f32 %v734_v20, %v605_v8  ;;  %v736_v22 = vpop.f32.mrb[6].mxu0 }
 0x205   : > { %v737_v23 = vpop.f32.mrb[7].mxu0  ;;  %v814_v22 = vsel %vm777_vm3, %v811_v55, %v813_v14  ;;  %v1970_v55 = vld [vmem:[#allocation5 + $0xe4] ss:$16 sps:$4 sm:$0xff]  }
 0x206   : > { %v741_v24 = vsub.f32 0.0, %v735_v21 }
 0x208   : > { %v746_v25 = vmul.f32 1.442695, %v741_v24 }
 0x20a   : > { %2018 = vpow2.f32 %v746_v25  ;;  %v1928_v25 = vld [vmem:[#allocation5 + $0x4] ss:$16 sps:$4 sm:$0xff]  }
 0x20b   : > { %1078 = vmatprep.subr.bf16.mxu1 %v1928_v25 }
 0x20c   : > { %v2015_v26 = vpop.eup %2014 }
 0x20d   : > { %v748_v27 = vadd.f32 1.0, %v2015_v26  ;;  %v1932_v26 = vld [vmem:[#allocation5 + $0xc] ss:$16 sps:$4 sm:$0xff]  }
 0x20e   : > { %v2017_v28 = vpop.eup %2016  ;;  %1121 = vmatprep.subr.bf16.mxu0 %v1932_v26 }
 0x20f   : > { %2020 = vrcp.f32 %v748_v27  ;;  %v749_v29 = vadd.f32 1.0, %v2017_v28  ;;  %v1930_v27 = vld [vmem:[#allocation5 + $0x8] ss:$16 sps:$4 sm:$0xff]   ;;  %v1933_v28 = vld [vmem:[#allocation5] ss:$16 sps:$4 sm:$0xff]  }
 0x210   : > { %1079 = vmatpush1.bf16.msra.mxu1 %v1933_v28  ;;  %1122 = vmatpush1.bf16.msra.mxu0 %v1930_v27  ;;  %v1978_v27 = vld [vmem:[#allocation7] sm:$0xff]  }
 0x211   : > { %2022 = vrcp.f32 %v749_v29  ;;  %v1934_v29 = vld [vmem:[#allocation5 + $0x24] ss:$16 sps:$4 sm:$0xff]   ;;  %1123 = vmatprep.subr.bf16.mxu0 %v1938_v31  ;;  %v1980_v31 = vld [vmem:[#allocation7 + $0x48] sm:$0xff]  }
 0x212   : > { %1080 = vmatprep.subr.bf16.mxu1 %v1934_v29  ;;  %v1979_v28 = vld [vmem:[#allocation7 + $0x80] sm:$0xff]  }
 0x214   : > { %v2019_v32 = vpop.eup %2018  ;;  %1081 = vmatpush1.bf16.msra.mxu1 %v1939_v33  ;;  %v1982_v33 = vld [vmem:[#allocation7 + $0x8] sm:$0xff]  }
 0x215   : > { %v750_v35 = vadd.f32 1.0, %v2019_v32  ;;  %v1936_v32 = vld [vmem:[#allocation5 + $0x28] ss:$16 sps:$4 sm:$0xff]  }
 0x216   : > { %1124 = vmatpush1.bf16.msra.mxu0 %v1936_v32  ;;  %v1981_v32 = vld [vmem:[#allocation7 + $0xc8] sm:$0xff]  }
 0x217   : > { %2024 = vrcp.f32 %v750_v35  ;;  %v1940_v35 = vld [vmem:[#allocation5 + $0x44] ss:$16 sps:$4 sm:$0xff]   ;;  %1125 = vmatprep.subr.bf16.mxu0 %v1944_v36 }
 0x218   : > { %1082 = vmatprep.subr.bf16.mxu1 %v1940_v35  ;;  %v1983_v35 = vld [vmem:[#allocation7 + $0x88] sm:$0xff]   ;;  %v1984_v36 = vld [vmem:[#allocation7 + $0x50] sm:$0xff]  }
 0x219   : > { %v2021_v39 = vpop.eup %2020 }
 0x21a   : > { %v754_v43 = vmul.f32 %v2021_v39, %v723_v38  ;;  %v1945_v38 = vld [vmem:[#allocation5 + $0x40] ss:$16 sps:$4 sm:$0xff]   ;;  %1126 = vmatpush1.bf16.msra.mxu0 %v1942_v37  ;;  %v1946_v39 = vld [vmem:[#allocation5 + $0x64] ss:$16 sps:$4 sm:$0xff]  }
 0x21b   : > { %v2023_v47 = vpop.eup %2022  ;;  %1083 = vmatpush1.bf16.msra.mxu1 %v1945_v38  ;;  %v1985_v37 = vld [vmem:[#allocation7 + $0xd0] sm:$0xff]  }
 0x21c   : > { %v755_v48 = vmul.f32 %v2023_v47, %v727_v45  ;;  %v757_v49 = vmul.f32 %v1670_v42, %v754_v43  ;;  %v1951_v42 = vld [vmem:[#allocation5 + $0x60] ss:$16 sps:$4 sm:$0xff]   ;;  %1084 = vmatprep.subr.bf16.mxu1 %v1946_v39  ;;  %v1952_v43 = vld [vmem:[#allocation5 + $0x84] ss:$16 sps:$4 sm:$0xff]   ;;  %v1954_v45 = vld [vmem:[#allocation5 + $0x88] ss:$16 sps:$4 sm:$0xff]  }
 0x21d   : > { %v1958_v47 = vld [vmem:[#allocation5 + $0xa4] ss:$16 sps:$4 sm:$0xff]  }
 0x21e   : > { %v771_v52 = vmul.f32 %v770_v44, %v757_v49  ;;  %v772_v53 = vmul.f32 %v770_v44, %v755_v48  ;;  %v791_v54 = vmul.f32 %v790_v40, %v757_v49  ;;  %v792_v56 = vmul.f32 %v790_v40, %v755_v48  ;;  %v1986_v38 = vld [vmem:[#allocation7 + $0x10] sm:$0xff]  }
 0x21f   : > { %v765_v62 = vmul.f32 %v764_v51, %v757_v49  ;;  %v766_v17 = vmul.f32 %v764_v51, %v755_v48  ;;  %1085 = vmatpush1.bf16.msra.mxu1 %v1951_v42  ;;  %v1962_v48 = vld [vmem:[#allocation5 + $0xac] ss:$16 sps:$4 sm:$0xff]   ;;  %v1960_v49 = vld [vmem:[#allocation5 + $0xa8] ss:$16 sps:$4 sm:$0xff]   ;;  %v1964_v51 = vld [vmem:[#allocation5 + $0xc4] ss:$16 sps:$4 sm:$0xff]  }
 0x220   : > { %v778_v58 = vrot.slane %v771_v52, 1  ;;  %v779_v59 = vrot.slane %v772_v53, 1  ;;  %v798_v60 = vrot.slane %v791_v54, 2  ;;  %v799_v63 = vrot.slane %v792_v56, 2  ;;  %1086 = vmatprep.subr.bf16.mxu1 %v1952_v43  ;;  %v1968_v52 = vld [vmem:[#allocation5 + $0xcc] ss:$16 sps:$4 sm:$0xff]  }
 0x221   : > { %v2025_v61 = vpop.eup %2024  ;;  %v1966_v53 = vld [vmem:[#allocation5 + $0xc8] ss:$16 sps:$4 sm:$0xff]   ;;  %v1969_v54 = vld [vmem:[#allocation5 + $0xc0] ss:$16 sps:$4 sm:$0xff]   ;;  %v1974_v56 = vld [vmem:[#allocation5 + $0xec] ss:$16 sps:$4 sm:$0xff]  }
 0x222   : > { %v756_v0 = vmul.f32 %v2025_v61, %v733_v57  ;;  %v780_v4 = vsel %vm777_vm3, %v778_v58, %v779_v59  ;;  %v800_v8 = vsel %vm797_vm4, %v798_v60, %v799_v63  ;;  %v1972_v57 = vld [vmem:[#allocation5 + $0xe8] ss:$16 sps:$4 sm:$0xff]   ;;  %v1975_v58 = vld [vmem:[#allocation5 + $0xe0] ss:$16 sps:$4 sm:$0xff]  }
 0x223   : > { %v785_v7 = vadd.f32 %v780_v4, %v765_v62  ;;  %1087 = vmatpush1.bf16.msra.mxu1 %v1957_v46  ;;  %v1977_v60 = vld [vmem:[#allocation7 + $0xc0] sm:$0xff]   ;;  %v1987_v39 = vld [vmem:[#allocation7 + $0x90] sm:$0xff]   ;;  %v1990_v42 = vld [vmem:[#allocation7 + $0x18] sm:$0xff]  }
 0x224   : > { %v759_v1 = vmul.f32 %v1671_v3, %v756_v0  ;;  %1088 = vmatprep.subr.bf16.mxu1 %v1958_v47  ;;  %v1991_v43 = vld [vmem:[#allocation7 + $0x98] sm:$0xff]   ;;  %v1994_v46 = vld [vmem:[#allocation7 + $0x20] sm:$0xff]  }
 0x225   : > { %v805_v10 = vadd.f32 %v800_v8, %v785_v7  ;;  %v1995_v47 = vld [vmem:[#allocation7 + $0xa0] sm:$0xff]  }
 0x226   : > { %v773_v11 = vmul.f32 %v770_v44, %v759_v1  ;;  %v793_v12 = vmul.f32 %v790_v40, %v759_v1  ;;  %v1950_v40 = vld [vmem:[#allocation5 + $0x6c] ss:$16 sps:$4 sm:$0xff]  }
 0x227   : > { %v2479_v13 = vadd.f32 %v812_v9, %v805_v10  ;;  %1127 = vmatprep.subr.bf16.mxu0 %v1950_v40  ;;  %v1956_v44 = vld [vmem:[#allocation5 + $0x8c] ss:$16 sps:$4 sm:$0xff]   ;;  %1089 = vmatpush1.bf16.msra.mxu1 %v1963_v50 }
 0x228   : > { %v781_v15 = vrot.slane %v773_v11, 1  ;;  %v801_v16 = vrot.slane %v793_v12, 2  ;;  %1128 = vmatpush1.bf16.msra.mxu0 %v1948_v41  ;;  %1090 = vmatprep.subr.bf16.mxu1 %v1964_v51  ;;  %v1988_v40 = vld [vmem:[#allocation7 + $0x58] sm:$0xff]   ;;  %v1998_v50 = vld [vmem:[#allocation7 + $0x28] sm:$0xff]  }
 0x229   : > { %821 = vadd.xlane.f32.xlu0 %v2479_v13  ;;  %v825_v20 = vmul.f32 %v2479_v13, %v2479_v13  ;;  %1129 = vmatprep.subr.bf16.mxu0 %v1956_v44  ;;  %v1989_v41 = vld [vmem:[#allocation7 + $0xd8] sm:$0xff]   ;;  %v1992_v44 = vld [vmem:[#allocation7 + $0x60] sm:$0xff]   ;;  %v1999_v51 = vld [vmem:[#allocation7 + $0xa8] sm:$0xff]  }
 0x22a   : > { %v782_v18 = vsel %vm777_vm3, %v779_v59, %v781_v15  ;;  %v802_v19 = vsel %vm797_vm4, %v799_v63, %v801_v16  ;;  %v1976_v59 = vld [vmem:[#allocation7 + $0x40] sm:$0xff]  }
 0x22b   : > { %v786_v21 = vadd.f32 %v782_v18, %v766_v17  ;;  %1091 = vmatpush1.bf16.msra.mxu1 %v1969_v54  ;;  %v1690_v18 = vld [vmem:[%s2575_s6] ss:$0 sm:$0xff] }
 0x22c   : > { %1130 = vmatpush1.bf16.msra.mxu0 %v1954_v45  ;;  %1092 = vmatprep.subr.bf16.mxu1 %v1970_v55  ;;  %v1993_v45 = vld [vmem:[#allocation7 + $0xe0] sm:$0xff]   ;;  %v2002_v54 = vld [vmem:[#allocation7 + $0x30] sm:$0xff]  }
 0x22d   : > { %827 = vadd.xlane.f32.xlu0 %v825_v20  ;;  %v806_v23 = vadd.f32 %v802_v19, %v786_v21  ;;  %1131 = vmatprep.subr.bf16.mxu0 %v1962_v48  ;;  %v1996_v48 = vld [vmem:[#allocation7 + $0x68] sm:$0xff]   ;;  %v2003_v55 = vld [vmem:[#allocation7 + $0xb0] sm:$0xff]  }
 0x22f   : > { %v2488_v24 = vadd.f32 %v814_v22, %v806_v23  ;;  %1093 = vmatpush1.bf16.msra.mxu1 %v1975_v58  ;;  %v1691_v23 = vld [vmem:[%s2576_s7] ss:$0 sm:$0xff]  ;;  %v2006_v58 = vld [vmem:[#allocation7 + $0x38] sm:$0xff]  }
 0x230   : > { %1132 = vmatpush1.bf16.msra.mxu0 %v1960_v49  ;;  %1763 = vmatprep.subr.bf16.mxu1 %v1976_v59  ;;  %v1997_v49 = vld [vmem:[#allocation7 + $0xe8] sm:$0xff]   ;;  %v2007_v59 = vld [vmem:[#allocation7 + $0xb8] sm:$0xff]  }
 0x231   : > { %823 = vadd.xlane.f32.xlu1 %v2488_v24  ;;  %v826_v2 = vmul.f32 %v2488_v24, %v2488_v24  ;;  %1133 = vmatprep.subr.bf16.mxu0 %v1968_v52  ;;  %v2000_v52 = vld [vmem:[#allocation7 + $0x70] sm:$0xff]  }
 0x234   : > { %1134 = vmatpush1.bf16.msra.mxu0 %v1966_v53  ;;  %v2001_v53 = vld [vmem:[#allocation7 + $0xf0] sm:$0xff]  }
 0x235   : > { %829 = vadd.xlane.f32.xlu1 %v826_v2  ;;  %1135 = vmatprep.subr.bf16.mxu0 %v1974_v56  ;;  %v2004_v56 = vld [vmem:[#allocation7 + $0x78] sm:$0xff]  }
 0x238   : > { %1136 = vmatpush1.bf16.msra.mxu0 %v1972_v57  ;;  %v2005_v57 = vld [vmem:[#allocation7 + $0xf8] sm:$0xff]  }
 0x239   : > { %1785 = vmatprep.subr.bf16.mxu0 %v1977_v60  ;;  %v896_v60 = vld [vmem:[%s2578_s9] sm:$0xf] }
 0x2b6   : > { %v822_v61 = vpop.xlane.xlu0 %821 }
 0x2b7   : > { %v831_v62 = vmul.f32 0.03125, %v822_v61  ;;  %v912_v61 = vsub.s32 3, %v2451_v5 }
 0x2b9   : > { %v835_v3 = vmul.f32 %v831_v62, %v831_v62  ;;  %v839_v16 = vsub.f32 %v2479_v13, %v831_v62  ;;  %v901_v62 = vrot.slane %v896_v60, %v2461_v30 }
 0x2ba   : > { %v828_v63 = vpop.xlane.xlu0 %827 }
 0x2bb   : > { %v833_v0 = vmul.f32 0.03125, %v828_v63  ;;  %v909_v63 = vrot.slane %v896_v60, %v789_v34 }
 0x2bd   : > { %v837_v4 = vsub.f32 %v833_v0, %v835_v3  ;;  %v905_v3 = vrot.slane %v896_v60, %v2454_v6  ;;  %v913_v0 = vrot.slane %v896_v60, %v912_v61 }
 0x2be   : > { %v824_v7 = vpop.xlane.xlu1 %823 }
 0x2bf   : > { %v841_v8 = vadd.f32 1e-05, %v837_v4  ;;  %v832_v9 = vmul.f32 0.03125, %v824_v7 }
 0x2c1   : > { %2026 = vrsqrt.f32 %v841_v8  ;;  %v836_v10 = vmul.f32 %v832_v9, %v832_v9  ;;  %v840_v19 = vsub.f32 %v2488_v24, %v832_v9 }
 0x2c2   : > { %v830_v1 = vpop.xlane.xlu1 %829 }
 0x2c3   : > { %v834_v11 = vmul.f32 0.03125, %v830_v1 }
 0x2c5   : > { %v838_v12 = vsub.f32 %v834_v11, %v836_v10 }
 0x2c7   : > { %v842_v14 = vadd.f32 1e-05, %v838_v12 }
 0x2c9   : > { %2028 = vrsqrt.f32 %v842_v14 }
 0x2cb   : > { %v2027_v15 = vpop.eup %2026 }
 0x2cc   : > { %v845_v17 = vmul.f32 %v2027_v15, %v839_v16 }
 0x2ce   : > { %v853_v22 = vmul.f32 %v1690_v18, %v845_v17 }
 0x2d0   : > { %v861_v25 = vadd.f32 %v1691_v23, %v853_v22 }
 0x2d3   : > { %v2029_v20 = vpop.eup %2028 }
 0x2d4   : > { %v846_v21 = vmul.f32 %v2029_v20, %v840_v19 }
 0x2d6   : > { %v854_v2 = vmul.f32 %v1690_v18, %v846_v21 }
 0x2d8   : > { %v862_v26 = vadd.f32 %v1691_v23, %v854_v2 }
 0x2da   : > { %v863_v29 = vpack.c.bf16 %v862_v26, %v861_v25 }
 0x2dc   : > { %1111 = vmatmul.mubr.bf16.vlgmr.msra.gmra.mrb[0].mxu1 %v863_v29  ;;  %1154 = vmatmul.mubr.bf16.vlgmr.msra.gmra.mrb[8].mxu0 %v863_v29 }
 0x2dd   : > { %1764 = vmatpush3.bf16.msra.mxu1 %v1978_v27  ;;  %1786 = vmatpush3.bf16.msra.mxu0 %v1979_v28 }
 0x2de   : > { %1765 = vmatprep.subr.bf16.mxu1 %v1980_v31  ;;  %1787 = vmatprep.subr.bf16.mxu0 %v1981_v32 }
 0x2e1   : > { %1766 = vmatpush3.bf16.msra.mxu1 %v1982_v33  ;;  %1788 = vmatpush3.bf16.msra.mxu0 %v1983_v35  ;;  %v1724_v33 = vld [vmem:[%s2580_s11] ss:$0 sm:$0xff] }
 0x2e2   : > { %1767 = vmatprep.subr.bf16.mxu1 %v1984_v36  ;;  %1789 = vmatprep.subr.bf16.mxu0 %v1985_v37 }
 0x2e5   : > { %1768 = vmatpush3.bf16.msra.mxu1 %v1986_v38  ;;  %1790 = vmatpush3.bf16.msra.mxu0 %v1987_v39 }
 0x2e6   : > { %1769 = vmatprep.subr.bf16.mxu1 %v1988_v40  ;;  %1791 = vmatprep.subr.bf16.mxu0 %v1989_v41 }
 0x2e9   : > { %1770 = vmatpush3.bf16.msra.mxu1 %v1990_v42  ;;  %1792 = vmatpush3.bf16.msra.mxu0 %v1991_v43 }
 0x2ea   : > { %1771 = vmatprep.subr.bf16.mxu1 %v1992_v44  ;;  %1793 = vmatprep.subr.bf16.mxu0 %v1993_v45 }
 0x2ed   : > { %1772 = vmatpush3.bf16.msra.mxu1 %v1994_v46  ;;  %1794 = vmatpush3.bf16.msra.mxu0 %v1995_v47 }
 0x2ee   : > { %1773 = vmatprep.subr.bf16.mxu1 %v1996_v48  ;;  %1795 = vmatprep.subr.bf16.mxu0 %v1997_v49 }
 0x2f1   : > { %1774 = vmatpush3.bf16.msra.mxu1 %v1998_v50  ;;  %1796 = vmatpush3.bf16.msra.mxu0 %v1999_v51 }
 0x2f2   : > { %1775 = vmatprep.subr.bf16.mxu1 %v2000_v52  ;;  %1797 = vmatprep.subr.bf16.mxu0 %v2001_v53 }
 0x2f5   : > { %1776 = vmatpush3.bf16.msra.mxu1 %v2002_v54  ;;  %1798 = vmatpush3.bf16.msra.mxu0 %v2003_v55 }
 0x2f6   : > { %1777 = vmatprep.subr.bf16.mxu1 %v2004_v56  ;;  %1799 = vmatprep.subr.bf16.mxu0 %v2005_v57 }
 0x2f9   : > { %1778 = vmatpush3.bf16.msra.mxu1 %v2006_v58  ;;  %1800 = vmatpush3.bf16.msra.mxu0 %v2007_v59 }
 0x3af   : > { %v1112_v4 = vpop.f32.mrb[0].mxu1  ;;  %v1155_v7 = vpop.f32.mrb[8].mxu0 }
 0x3b0   : > { %v1113_v8 = vadd.f32 %v1112_v4, %v901_v62  ;;  %v1156_v9 = vadd.f32 %v1155_v7, %v909_v63  ;;  %v1114_v1 = vpop.f32.mrb[1].mxu1  ;;  %v1157_v10 = vpop.f32.mrb[9].mxu0 }
 0x3b1   : > { %v1115_v11 = vadd.f32 %v1114_v1, %v905_v3  ;;  %v1158_v12 = vadd.f32 %v1157_v10, %v913_v0  ;;  %v1116_v14 = vpop.f32.mrb[2].mxu1  ;;  %v1159_v15 = vpop.f32.mrb[10].mxu0 }
 0x3b2   : > { %v1117_v16 = vadd.f32 %v1116_v14, %v901_v62  ;;  %v1160_v17 = vadd.f32 %v1159_v15, %v909_v63  ;;  %v1118_v18 = vpop.f32.mrb[3].mxu1  ;;  %v1161_v30 = vpop.f32.mrb[11].mxu0  ;;  %v1164_v34 = vmax.f32 %v1113_v8, 0.0  ;;  %v1166_v6 = vmax.f32 %v1156_v9, 0.0 }
 0x3b3   : > { %v1119_v19 = vadd.f32 %v1118_v18, %v905_v3  ;;  %v1162_v5 = vadd.f32 %v1161_v30, %v913_v0  ;;  %v1165_v22 = vmax.f32 %v1115_v11, 0.0  ;;  %v1167_v23 = vmax.f32 %v1158_v12, 0.0 }
 0x3b4   : > { %v1168_v20 = vmax.f32 %v1117_v16, 0.0  ;;  %v1170_v21 = vmax.f32 %v1160_v17, 0.0 }
 0x3b5   : > { %v1169_v2 = vmax.f32 %v1119_v19, 0.0  ;;  %v1171_v25 = vmax.f32 %v1162_v5, 0.0 }
 0x3b6   : > { %v1172_v26 = vpack.c.bf16 %v1168_v20, %v1164_v34  ;;  %v1174_v27 = vpack.c.bf16 %v1170_v21, %v1166_v6 }
 0x3b7   : > { %v1173_v28 = vpack.c.bf16 %v1169_v2, %v1165_v22  ;;  %v1175_v29 = vpack.c.bf16 %v1171_v25, %v1167_v23 }
 0x3b9   : > { %1471 = vmatprep.mubr.bf16.mxu1 %v1173_v28  ;;  %1512 = vmatprep.mubr.bf16.mxu0 %v1175_v29 }
 0x3ba   : > { %1472 = vmatmul.mubr.bf16.vlgmr.msra.gmra.mrb[4].mxu1 %v1172_v26  ;;  %1513 = vmatmul.mubr.bf16.vlgmr.msra.gmra.mrb[12].mxu0 %v1174_v27 }
 0x48d   : > { %v1779_v31 = vpop.f32.mrb[4].mxu1  ;;  %v1801_v32 = vpop.f32.mrb[12].mxu0 }
 0x48e   : > { %v1780_v35 = vpop.f32.mrb[5].mxu1  ;;  %v1802_v36 = vpop.f32.mrb[13].mxu0 }
 0x48f   : > { %v1781_v37 = vadd.f32 %v1780_v35, %v1779_v31  ;;  %v1803_v38 = vadd.f32 %v1802_v36, %v1801_v32  ;;  %v1782_v39 = vpop.f32.mrb[6].mxu1  ;;  %v1804_v40 = vpop.f32.mrb[14].mxu0 }
 0x490   : > { %v1783_v41 = vpop.f32.mrb[7].mxu1  ;;  %v1805_v42 = vpop.f32.mrb[15].mxu0 }
 0x491   : > { %v1474_v43 = vadd.f32 %v1781_v37, %v1724_v33  ;;  %v1784_v44 = vadd.f32 %v1783_v41, %v1782_v39  ;;  %v1806_v45 = vadd.f32 %v1805_v42, %v1804_v40 }
 0x493   : > { %v1515_v46 = vadd.f32 %v1803_v38, %v1474_v43  ;;  %v1477_v47 = vadd.f32 %v1784_v44, %v1724_v33 }
 0x495   : > { %v1521_v48 = vadd.f32 %v1515_v46, %v2479_v13  ;;  %v1518_v49 = vadd.f32 %v1806_v45, %v1477_v47 }
 0x497   : > { %1523 = vst [vmem:[%s474_s29] sm:$0xff] %v1521_v48  ;;  %v1522_v50 = vadd.f32 %v1518_v49, %v2488_v24 }
 0x499   : > { %1524 = vst [vmem:[%s474_s29 + $0x8] sm:$0xff] %v1522_v50 }
 0x49a   : > { %2127 = shalt.err (!%p2124_p6)
}
 0x49b   : > { %s2128_s28 = scalar_lea.hbm %s2521_s21, 256  ;;  %s2132_s17 = scalar_lea.hbm %s2617_s14, 512 }
 0x49c   : > { %p2129_p7 = scmp.ne.s32.totalorder %s2521_s21, %s2128_s28  ;;  %p2133_p4 = scmp.lt.u32.totalorder %s2521_s21, %s2617_s14 }
 0x49d   : > { %p2134_p8 = scmp.lt.u32.totalorder %s2132_s17, %s2128_s28  ;;  %p2136_p13 = scmp.lt.u32.totalorder %s2128_s28, %s2521_s21 }
 0x49e   : > { %p2130_p9 = pnand %p2129_p7, %p2618_p10 }
 0x49f   : > { %p2135_p1 = por %p2134_p8, %p2133_p4 }
 0x4a0   : > { %p2131_p12 = pneg %p2130_p9 }
 0x4a1   : > { %p2137_p11 = por %p2136_p13, %p2135_p1 }
 0x4a3   : > { %p2138_p0 = pnand %p2137_p11, %p2131_p12 }
 0x4a5   : > { %2141 = shalt.err (!%p2138_p0)
}
 0x4a6   : > { %s2214_s16 = smov 128   ;;  %s2215_s30 = smov 8  }
 0x4a7   : > { %1820 = dma.vmem_to_hbm [thread:$0]  (%p2618_p10), %s2515_s15, 256, %s2521_s21, %s2523_s12, %s2214_s16, %s2214_s16, %s2215_s30  }
 0x4a8 PF: > { %s2619_s27 = sld [smem:[#allocation15_spill]]  ;;  %s2620_s25 = sld [smem:[#allocation12_spill]] }
 0x4a9   : > { %s2621_s24 = sld [smem:[#allocation18_spill]] }
 0x4ae   : > { %p1842_p2 = scmp.ge.s32.totalorder %s2619_s27, 2  ;;  %s1556_s26 = sand.u32 1, %s2620_s25  }
 0x4af   : > { %p2622_p3 = scmp.ne.s32.totalorder %s2621_s24, 0  ;;  %s1557_s13 = scalar_lea.sflag [#allocation4], %s1556_s26 }
 0x4b1   : > { %p1833_p5 = pnand %p1842_p2, %p2622_p3 }
 0x4b3   : > { %2175 = dma.done.wait (!%p1833_p5), %s1557_s13, 256  }
 0x4b4   : > { %2177 = vsyncadd (!%p1833_p5), %s1557_s13, 4294967040  ;;  %s27_s26 = sadd.s32 1, %s2619_s27   ;;  %s2623_s8 = sld [smem:[#allocation13_spill]] }
 0x4b5   : > { %p24_p6 = scmp.ge.s32.totalorder %s27_s26, 4   ;;  %s2624_s23 = sld [smem:[#allocation19_spill]] }
 0x4b6   : > { %s2625_s24 = sld [smem:[#allocation14_spill]]  ;;  %s2626_s25 = sld [smem:[#allocation16_spill]] }
 0x4b7   : > { %s2627_s21 = smov %s2184_s22  ;;  %26 = sbr.rel (!%p24_p6) target bundleno = 9 (0x9), region = 116 }
 0x4ba   : > { %s2628_s22 = smov %s2623_s8 }
 0x4be   :  { %1562 = vsyncpa [#allocation3], 1 }
 0x4bf   :  { %1564 = vsyncpa [#allocation3 + $0x1], 1 }
 0x4c0   :  { %1565 = vsyncpa [#allocation6], 1 }
 0x4c1   :  { %1566 = vsyncpa [#allocation4], 1 }
 0x4c2   :  { %1568 = vsyncpa [#allocation4 + $0x1], 1 }

</bundles_post_ra>
